<compile_context>
chip_gen: v7x
topology: tpu7x:2x2x1
jax: 0.10.0
libtpu: 0.0.40
codegen_flags: <defaults>
</compile_context>

<pallas_src>
import functools

import jax
import jax.numpy as jnp
import numpy as np
from jax import lax
from jax.experimental import pallas as pl
from jax.experimental.pallas import tpu as pltpu

EPS = 1e-5
LANES = 128          # TPU lane width; channels are zero-padded to this.

# MXU input dtype. float32 keeps the self-test within ~1e-4 of the f32
# reference at these toy sizes; flip to jnp.bfloat16 on v6e/v7x for ~2x MXU
# rate (accumulation stays f32 via preferred_element_type).
MATMUL_DTYPE = jnp.float32


def _relu6(v):
    return jnp.clip(v, 0.0, 6.0)


def _mm(a, b):
    return jnp.dot(a.astype(MATMUL_DTYPE), b.astype(MATMUL_DTYPE),
                   preferred_element_type=jnp.float32)


# --------------------------------------------------------------------------
# Stage 1: 1x1 conv (channel mix) + ReLU6, plus per-image BN partial sums.
# --------------------------------------------------------------------------
def _stage1_kernel(x_ref, w1_ref, b1_ref, s1_ref, sum_ref, sq_ref):
    _, H, W, C = x_ref.shape
    x = x_ref[...].reshape(H * W, C)
    h = _relu6(_mm(x, w1_ref[...]) + b1_ref[...])
    s1_ref[...] = h.reshape(1, H, W, C)
    sum_ref[...] = jnp.sum(h, axis=0, keepdims=True).reshape(1, 1, C)
    sq_ref[...] = jnp.sum(h * h, axis=0, keepdims=True).reshape(1, 1, C)


# --------------------------------------------------------------------------
# Stage 2: folded BN affine + KxK 'same' conv via one im2col matmul + ReLU6,
#          plus per-image BN partial sums for the second BatchNorm.
# --------------------------------------------------------------------------
def _stage2_kernel(s1_ref, sc1_ref, sh1_ref, w2_ref, b2_ref,
                   s2_ref, sum_ref, sq_ref, *, K):
    _, H, W, C = s1_ref.shape
    P = (K - 1) // 2
    HW = H * W

    # BatchNorm folded into a single per-channel affine (scale/shift computed
    # outside from globally-reduced stats), applied lane-dense.
    h = s1_ref[...].reshape(HW, C) * sc1_ref[...] + sh1_ref[...]

    # im2col: build (HW, K*K*C) patch matrix with static row shifts
    # (zero-fill past the image top/bottom) + per-row edge masks for the
    # horizontal taps, then one full-width MXU matmul instead of K*K narrow
    # ones.  No padded scratch buffer, no full-buffer zero fill.
    col = lax.broadcasted_iota(jnp.int32, (HW, 1), 0) % W
    taps = []
    for kh in range(K):
        dh = kh - P
        for kw in range(K):
            dw = kw - P
            s = dh * W + dw                     # static row shift
            if s > 0:
                shifted = jnp.concatenate(
                    [h[s:, :], jnp.zeros((s, C), h.dtype)], axis=0)
            elif s < 0:
                shifted = jnp.concatenate(
                    [jnp.zeros((-s, C), h.dtype), h[:HW + s, :]], axis=0)
            else:
                shifted = h
            if dw != 0:
                ok = (col + dw >= 0) & (col + dw <= W - 1)
                shifted = jnp.where(ok, shifted, 0.0)
            taps.append(shifted)
    patches = jnp.concatenate(taps, axis=1)      # (HW, K*K*C), lane-dense
    h2 = _relu6(_mm(patches, w2_ref[...]) + b2_ref[...])

    s2_ref[...] = h2.reshape(1, H, W, C)
    sum_ref[...] = jnp.sum(h2, axis=0, keepdims=True).reshape(1, 1, C)
    sq_ref[...] = jnp.sum(h2 * h2, axis=0, keepdims=True).reshape(1, 1, C)


# --------------------------------------------------------------------------
# Stage 3: folded BN affine + final 1x1 conv + residual add + ReLU6.
# --------------------------------------------------------------------------
def _stage3_kernel(s2_ref, sc2_ref, sh2_ref, w3_ref, b3_ref, x_ref, o_ref):
    _, H, W, C = s2_ref.shape
    h2 = s2_ref[...].reshape(H * W, C) * sc2_ref[...] + sh2_ref[...]
    out = _mm(h2, w3_ref[...]) + b3_ref[...] + x_ref[...].reshape(H * W, C)
    o_ref[...] = _relu6(out).reshape(1, H, W, C).astype(o_ref.dtype)


# --------------------------------------------------------------------------
# Wrapper
# --------------------------------------------------------------------------
def _pad_lanes(a, axis, target=LANES):
    pad = target - a.shape[axis]
    if pad == 0:
        return a
    widths = [(0, 0)] * a.ndim
    widths[axis] = (0, pad)
    return jnp.pad(a, widths)


def classic_bottleneck_forward(x_nchw, params):
    """x_nchw: (N, Ce, H, W) float32, matching the PyTorch module's input."""
    w1, b1, g1, be1, w2, b2, g2, be2, w3, b3 = params
    N, Ce, H, W = x_nchw.shape
    K = w2.shape[0]
    C = LANES
    NHW = N * H * W

    # NCHW -> NHWC, channels zero-padded to the lane width.  Padded channels
    # stay exactly zero through every stage (all padded weight rows/cols,
    # biases and BN shifts are zero).
    # TODO(synk): at real sizes keep activations NHWC upstream to avoid this
    # boundary transpose (a full HBM read+write).
    x = _pad_lanes(jnp.transpose(x_nchw, (0, 2, 3, 1)).astype(jnp.float32), 3, C)

    w1p = _pad_lanes(_pad_lanes(w1, 0, C), 1, C)            # (C, C)
    w3p = _pad_lanes(_pad_lanes(w3, 0, C), 1, C)            # (C, C)
    w2p = _pad_lanes(_pad_lanes(w2, 2, C), 3, C)            # (K, K, C, C) HWIO
    w2f = w2p.reshape(K * K * C, C)                         # im2col weight
    b1p = _pad_lanes(b1, 1, C)
    b2p = _pad_lanes(b2, 1, C)
    b3p = _pad_lanes(b3, 1, C)
    g1p, be1p = _pad_lanes(g1, 1, C), _pad_lanes(be1, 1, C)
    g2p, be2p = _pad_lanes(g2, 1, C), _pad_lanes(be2, 1, C)

    img = pl.BlockSpec((1, H, W, C), lambda n: (n, 0, 0, 0))
    stat = pl.BlockSpec((1, 1, C), lambda n: (n, 0, 0))

    def fixed(shape):
        # Weights / biases / BN affines: constant block index -> DMA'd once,
        # VMEM-resident across all grid steps.
        return pl.BlockSpec(shape, lambda n: (0,) * len(shape))

    cparams = pltpu.CompilerParams(dimension_semantics=("parallel",))

    # --- stage 1: 1x1 conv + ReLU6 + per-image BN partials -----------------
    s1, s1_sum, s1_sq = pl.pallas_call(
        _stage1_kernel,
        grid=(N,),
        in_specs=[img, fixed((C, C)), fixed((1, C))],
        out_specs=(img, stat, stat),
        out_shape=(jax.ShapeDtypeStruct((N, H, W, C), jnp.float32),
                   jax.ShapeDtypeStruct((N, 1, C), jnp.float32),
                   jax.ShapeDtypeStruct((N, 1, C), jnp.float32)),
        compiler_params=cparams,
    )(x, w1p, b1p)

    def bn_affine(sums, sqs, gamma, beta):
        # Global (whole-batch) stats from per-image partials; fold BN into a
        # single per-channel affine so the consumer kernel does one FMA.
        mean = jnp.sum(sums, axis=(0, 1)) / NHW
        var = jnp.sum(sqs, axis=(0, 1)) / NHW - mean * mean
        scale = gamma * lax.rsqrt(var + EPS)       # (1, C)
        shift = beta - mean * scale                # (1, C)
        return scale, shift

    sc1, sh1 = bn_affine(s1_sum, s1_sq, g1p, be1p)

    # --- stage 2: BN + KxK 'same' conv (im2col) + ReLU6 + BN partials -------
    s2, s2_sum, s2_sq = pl.pallas_call(
        functools.partial(_stage2_kernel, K=K),
        grid=(N,),
        in_specs=[img, fixed((1, C)), fixed((1, C)),
                  fixed((K * K * C, C)), fixed((1, C))],
        out_specs=(img, stat, stat),
        out_shape=(jax.ShapeDtypeStruct((N, H, W, C), jnp.float32),
                   jax.ShapeDtypeStruct((N, 1, C), jnp.float32),
                   jax.ShapeDtypeStruct((N, 1, C), jnp.float32)),
        compiler_params=cparams,
    )(s1, sc1, sh1, w2f, b2p)

    sc2, sh2 = bn_affine(s2_sum, s2_sq, g2p, be2p)

    # --- stage 3: BN + final 1x1 conv + residual + ReLU6 --------------------
    out = pl.pallas_call(
        _stage3_kernel,
        grid=(N,),
        in_specs=[img, fixed((1, C)), fixed((1, C)),
                  fixed((C, C)), fixed((1, C)), img],
        out_specs=img,
        out_shape=jax.ShapeDtypeStruct((N, H, W, C), jnp.float32),
        compiler_params=cparams,
    )(s2, sc2, sh2, w3p, b3p, x)

    return jnp.transpose(out[..., :Ce], (0, 3, 1, 2))       # NHWC -> NCHW


# --------------------------------------------------------------------------
# Params / reference / self-test
# --------------------------------------------------------------------------
def init_params(key, ext_c, int_c, k):
    ks = jax.random.split(key, 6)
    w1 = jax.random.normal(ks[0], (ext_c, int_c), jnp.float32) * 0.3      # 1x1
    b1 = jax.random.normal(ks[1], (1, int_c), jnp.float32) * 0.1
    w2 = jax.random.normal(ks[2], (k, k, int_c, int_c), jnp.float32) * 0.2  # HWIO
    b2 = jax.random.normal(ks[3], (1, int_c), jnp.float32) * 0.1
    w3 = jax.random.normal(ks[4], (int_c, ext_c), jnp.float32) * 0.3      # 1x1
    b3 = jax.random.normal(ks[5], (1, ext_c), jnp.float32) * 0.1
    # BatchNorm affine params at PyTorch init (weight=1, bias=0)
    g1 = jnp.ones((1, int_c), jnp.float32)
    be1 = jnp.zeros((1, int_c), jnp.float32)
    g2 = jnp.ones((1, int_c), jnp.float32)
    be2 = jnp.zeros((1, int_c), jnp.float32)
    return (w1, b1, g1, be1, w2, b2, g2, be2, w3, b3)


def reference_forward(x_nchw, params):
    """Pure-JAX reference (XLA convs) for correctness checking."""
    w1, b1, g1, be1, w2, b2, g2, be2, w3, b3 = params
    x = jnp.transpose(x_nchw, (0, 2, 3, 1)).astype(jnp.float32)

    def bn(h, g, be):
        mu = h.mean(axis=(0, 1, 2), keepdims=True)
        var = ((h - mu) ** 2).mean(axis=(0, 1, 2), keepdims=True)
        return (h - mu) / jnp.sqrt(var + EPS) * g + be

    h = jnp.clip(jnp.einsum('nhwc,cd->nhwd', x, w1) + b1, 0.0, 6.0)
    h = bn(h, g1, be1)
    h = lax.conv_general_dilated(h, w2, (1, 1), 'SAME',
                                 dimension_numbers=('NHWC', 'HWIO', 'NHWC')) + b2
    h = jnp.clip(h, 0.0, 6.0)
    h = bn(h, g2, be2)
    out = jnp.clip(jnp.einsum('nhwc,cd->nhwd', h, w3) + b3 + x, 0.0, 6.0)
    return jnp.transpose(out, (0, 3, 1, 2))


if __name__ == "__main__":
    key = jax.random.PRNGKey(0)
    kx, kp = jax.random.split(key)

    # ext_channels=8, int_channels=4, kernel_size=3 ; input NCHW (2, 8, 16, 16)
    N, Ce, H, W = 2, 8, 16, 16
    Ci, K = 4, 3

    x = jax.random.normal(kx, (N, Ce, H, W), jnp.float32)
    params = init_params(kp, Ce, Ci, K)

    out = classic_bottleneck_forward(x, params)
    out = jax.block_until_ready(out)

    ref = reference_forward(x, params)
    np.testing.assert_allclose(np.asarray(out), np.asarray(ref),
                               rtol=2e-4, atol=2e-4)
    print("KERNEL_OK")
</pallas_src>

<mosaic_0001>
module attributes {stable_mosaic.version = 11 : i64} {
  func.func @_stage1_kernel(%arg0: i32, %arg1: memref<1x16x16x128xf32, #tpu.memory_space<vmem>>, %arg2: memref<128x128xf32, #tpu.memory_space<vmem>>, %arg3: memref<1x128xf32, #tpu.memory_space<vmem>>, %arg4: memref<1x16x16x128xf32, #tpu.memory_space<vmem>>, %arg5: memref<1x1x128xf32, #tpu.memory_space<vmem>>, %arg6: memref<1x1x128xf32, #tpu.memory_space<vmem>>) attributes {dimension_semantics = [#tpu.dimension_semantics<parallel>], iteration_bounds = array<i64: 2>, scalar_prefetch = 0 : i64, scratch_operands = 0 : i64, tpu.core_type = #tpu.core_type<tc>, window_params = [{transform_indices = @transform_0, window_bounds = array<i64: 1, 16, 16, 128>}, {pipeline_mode = #tpu.pipeline_mode<synchronous>, transform_indices = @transform_1, window_bounds = array<i64: 128, 128>}, {pipeline_mode = #tpu.pipeline_mode<synchronous>, transform_indices = @transform_2, window_bounds = array<i64: 1, 128>}, {transform_indices = @transform_3, window_bounds = array<i64: 1, 16, 16, 128>}, {transform_indices = @transform_4, window_bounds = array<i64: 1, 1, 128>}, {transform_indices = @transform_5, window_bounds = array<i64: 1, 1, 128>}]} {
    %c0 = arith.constant 0 : index
    %c0_0 = arith.constant 0 : index
    %c0_1 = arith.constant 0 : index
    %c0_2 = arith.constant 0 : index
    %0 = vector.load %arg1[%c0, %c0_0, %c0_1, %c0_2] : memref<1x16x16x128xf32, #tpu.memory_space<vmem>>, vector<1x16x16x128xf32>
    %1 = vector.shape_cast %0 : vector<1x16x16x128xf32> to vector<256x128xf32>
    %c0_3 = arith.constant 0 : index
    %c0_4 = arith.constant 0 : index
    %2 = vector.load %arg2[%c0_3, %c0_4] : memref<128x128xf32, #tpu.memory_space<vmem>>, vector<128x128xf32>
    %cst = arith.constant dense<0.000000e+00> : vector<256x128xf32>
    %3 = tpu.matmul %1, %2, %cst {dimension_numbers = #tpu.dot_dimension_numbers<[1], [0], [0], [1], [0, 0, 1, 1], [], []>} : vector<256x128xf32>, vector<128x128xf32>, vector<256x128xf32> -> vector<256x128xf32>
    %c0_5 = arith.constant 0 : index
    %c0_6 = arith.constant 0 : index
    %4 = vector.load %arg3[%c0_5, %c0_6] : memref<1x128xf32, #tpu.memory_space<vmem>>, vector<1x128xf32>
    %5 = vector.broadcast %4 : vector<1x128xf32> to vector<256x128xf32>
    %6 = arith.addf %3, %5 : vector<256x128xf32>
    %cst_7 = arith.constant 0.000000e+00 : f32
    %cst_8 = arith.constant 6.000000e+00 : f32
    %7 = vector.broadcast %cst_7 : f32 to vector<256x128xf32>
    %8 = arith.maximumf %7, %6 : vector<256x128xf32>
    %9 = vector.broadcast %cst_8 : f32 to vector<256x128xf32>
    %10 = arith.minimumf %9, %8 : vector<256x128xf32>
    %11 = vector.shape_cast %10 : vector<256x128xf32> to vector<1x16x16x128xf32>
    %c0_9 = arith.constant 0 : index
    %c0_10 = arith.constant 0 : index
    %c0_11 = arith.constant 0 : index
    %c0_12 = arith.constant 0 : index
    %12 = vector.load %arg4[%c0_9, %c0_10, %c0_11, %c0_12] : memref<1x16x16x128xf32, #tpu.memory_space<vmem>>, vector<1x16x16x128xf32>
    tpu.vector_store %arg4[%c0_9, %c0_10, %c0_11, %c0_12], %11 {strides = array<i32>} : memref<1x16x16x128xf32, #tpu.memory_space<vmem>>, vector<1x16x16x128xf32>,
    %cst_13 = arith.constant dense<0.000000e+00> : vector<128xf32>
    %13 = vector.multi_reduction <add>, %10, %cst_13 [0] : vector<256x128xf32> to vector<128xf32>
    %14 = vector.shape_cast %13 : vector<128xf32> to vector<1x128xf32>
    %15 = vector.shape_cast %14 : vector<1x128xf32> to vector<1x1x128xf32>
    %c0_14 = arith.constant 0 : index
    %c0_15 = arith.constant 0 : index
    %c0_16 = arith.constant 0 : index
    %16 = vector.load %arg5[%c0_14, %c0_15, %c0_16] : memref<1x1x128xf32, #tpu.memory_space<vmem>>, vector<1x1x128xf32>
    tpu.vector_store %arg5[%c0_14, %c0_15, %c0_16], %15 {strides = array<i32>} : memref<1x1x128xf32, #tpu.memory_space<vmem>>, vector<1x1x128xf32>,
    %17 = arith.mulf %10, %10 : vector<256x128xf32>
    %cst_17 = arith.constant dense<0.000000e+00> : vector<128xf32>
    %18 = vector.multi_reduction <add>, %17, %cst_17 [0] : vector<256x128xf32> to vector<128xf32>
    %19 = vector.shape_cast %18 : vector<128xf32> to vector<1x128xf32>
    %20 = vector.shape_cast %19 : vector<1x128xf32> to vector<1x1x128xf32>
    %c0_18 = arith.constant 0 : index
    %c0_19 = arith.constant 0 : index
    %c0_20 = arith.constant 0 : index
    %21 = vector.load %arg6[%c0_18, %c0_19, %c0_20] : memref<1x1x128xf32, #tpu.memory_space<vmem>>, vector<1x1x128xf32>
    tpu.vector_store %arg6[%c0_18, %c0_19, %c0_20], %20 {strides = array<i32>} : memref<1x1x128xf32, #tpu.memory_space<vmem>>, vector<1x1x128xf32>,
    return
  }
  func.func @transform_0(%arg0: i32) -> (i32, i32, i32, i32) {
    %c0_i32 = arith.constant 0 : i32
    %c0_i32_0 = arith.constant 0 : i32
    %c0_i32_1 = arith.constant 0 : i32
    %c0_i32_2 = arith.constant 0 : i32
    return %arg0, %c0_i32, %c0_i32_0, %c0_i32_1 : i32, i32, i32, i32
  }
  func.func @transform_1(%arg0: i32) -> (i32, i32) {
    %c0_i32 = arith.constant 0 : i32
    %c0_i32_0 = arith.constant 0 : i32
    %c0_i32_1 = arith.constant 0 : i32
    return %c0_i32, %c0_i32_0 : i32, i32
  }
  func.func @transform_2(%arg0: i32) -> (i32, i32) {
    %c0_i32 = arith.constant 0 : i32
    %c0_i32_0 = arith.constant 0 : i32
    %c0_i32_1 = arith.constant 0 : i32
    return %c0_i32, %c0_i32_0 : i32, i32
  }
  func.func @transform_3(%arg0: i32) -> (i32, i32, i32, i32) {
    %c0_i32 = arith.constant 0 : i32
    %c0_i32_0 = arith.constant 0 : i32
    %c0_i32_1 = arith.constant 0 : i32
    %c0_i32_2 = arith.constant 0 : i32
    return %arg0, %c0_i32, %c0_i32_0, %c0_i32_1 : i32, i32, i32, i32
  }
  func.func @transform_4(%arg0: i32) -> (i32, i32, i32) {
    %c0_i32 = arith.constant 0 : i32
    %c0_i32_0 = arith.constant 0 : i32
    %c0_i32_1 = arith.constant 0 : i32
    return %arg0, %c0_i32, %c0_i32_0 : i32, i32, i32
  }
  func.func @transform_5(%arg0: i32) -> (i32, i32, i32) {
    %c0_i32 = arith.constant 0 : i32
    %c0_i32_0 = arith.constant 0 : i32
    %c0_i32_1 = arith.constant 0 : i32
    return %arg0, %c0_i32, %c0_i32_0 : i32, i32, i32
  }
}

</mosaic_0001>

<bundles_post_ra>
// kernel: tpu_custom_call.1
= control target key start
LH: loop header
LB: loop body
LE: loop exit
PB: predicated region body
PF: predicated region fallthrough
CT: control target
= control target key end

     0   :  { %11 = vsyncpa [#allocation3], 0  ;;  %s1933_s0 = inlined_call_operand.hbm [shape: f32[2,16,16,128], index: 0, kind: input, shape index: {}]   ;;  %s1934_s1 = inlined_call_operand.hbm [shape: f32[128,128], index: 1, kind: input, shape index: {}]   ;;  %s1935_s2 = inlined_call_operand.vmem [shape: f32[1,128], index: 2, kind: input, shape index: {}]   ;;  %s1936_s3 = inlined_call_operand.hbm [shape: f32[2,16,16,128], index: 3, kind: output, shape index: {0}]   ;;  %s1937_s4 = inlined_call_operand.hbm [shape: f32[2,1,128], index: 4, kind: output, shape index: {1}]   ;;  %s1938_s5 = inlined_call_operand.hbm [shape: f32[2,1,128], index: 5, kind: output, shape index: {2}]  }
   0x1   :  { %13 = vsyncpa [#allocation3 + $0x1], 0 }
   0x2   :  { %14 = vsyncpa [#allocation6], 0 }
   0x3   :  { %15 = vsyncpa [#allocation4], 0 }
   0x4   :  { %17 = vsyncpa [#allocation4 + $0x1], 0 }
   0x5   :  { %18 = vsyncpa [#allocation9], 0 }
   0x6   :  { %20 = vsyncpa [#allocation9 + $0x1], 0  ;;  %s1439_s18 = smov 0   ;;  %s1441_s19 = smov 0  }
   0x7   :  { %s1443_s20 = smov 0   ;;  %s1445_s21 = smov 0  }
   0x8 LB: > { %s1460_s22 = sadd.s32 4294967295, %s1398_s21   ;;  %s942_s23 = sadd.s32 4294967294, %s1398_s21   ;;  %s1398_s21 = sphi %s1445_s21, %s1958_s21   ;;  %s1394_s20 = sphi %s1443_s20, %s1957_s20   ;;  %s1390_s19 = sphi %s1441_s19, %s1956_s19   ;;  %s1386_s18 = sphi %s1439_s18, %s1955_s18  }
   0x9   : > { %p46_p0 = scmp.ne.s32.totalorder %s1390_s19, %s1386_s18  ;;  %p1939_p1 = scmp.eq.s32.totalorder %s1460_s22, 0 }
   0xa   : > { %p118_p3 = scmp.eq.s32.totalorder %s942_s23, 1  ;;  %p943_p5 = scmp.ge.s32.totalorder %s1398_s21, 1 }
   0xb   : > { %p1471_p4 = por %p1939_p1, %p46_p0  ;;  %p177_p7 = scmp.lt.s32.totalorder %s1398_s21, 3 }
   0xc   : > { %p1476_p6 = por %p118_p3, %p46_p0  ;;  %s1400_s27 = smov [#allocation5]  }
   0xd   : > { %s1942_s24 = scalar_select %p1471_p4, 1, 0 }
   0xe   : > { %s1943_s25 = scalar_select %p1476_p6, 1, 0 }
   0xf   : > { %p1481_p8 = pnand %p943_p5, %p177_p7  ;;  %s189_s28 = sshll.u32 %s1400_s27, 4  ;;  %s1485_s28 = int_to_ptr.vmem [resolvable:$true] %s189_s28 }
  0x10   : > { %s1497_s30 = sadd.s32 1, %s1398_s21   ;;  %s33_s6 = sadd.s32 1, %s1394_s20 }
  0x11   : > { %s1944_s26 = scalar_select %p1481_p8, 1, 0 }
  0x12   : > { %p1151_p9 = pneg %p1481_p8  ;;  %s30_s7 = ssub.s32 %s1398_s21, %s1497_s30 }
  0x13   : > { %s1210_s10 = scalar_lea.hbm %s1934_s1, 2048 }
  0x14   : > { %p1492_p11 = pnand %p1151_p9, %p1939_p1  ;;  %p1211_p12 = scmp.ne.s32.totalorder %s1934_s1, %s1210_s10 }
  0x15   : > { %p1217_p5 = scmp.lt.u32.totalorder %s1210_s10, %s1934_s1 }
  0x16   : > { %p1212_p13 = pneg %p1492_p11 }
  0x18   : > { %p1213_p0 = pnand %p1212_p13, %p1211_p12 }
  0x1a   : > { %p1214_p3 = pneg %p1213_p0 }
  0x1c   : > { %p1219_p7 = pnand %p1217_p5, %p1214_p3 }
  0x1e   : > { %1222 = shalt.err (!%p1219_p7)
}
  0x1f   : > { %s1223_s15 = scalar_lea.vmem %s1485_s28, 2048  ;;  %p1231_p2 = scmp.lt.s32.totalorder %s1485_s28, %s1485_s28 }
  0x20   : > { %p1224_p9 = scmp.ne.s32.totalorder %s1485_s28, %s1223_s15  ;;  %p1232_p6 = scmp.lt.s32.totalorder %s1223_s15, %s1223_s15 }
  0x22   : > { %p1226_p10 = pnand %p1224_p9, %p1212_p13  ;;  %p1233_p4 = por %p1232_p6, %p1231_p2 }
  0x24   : > { %p1227_p1 = pneg %p1226_p10 }
  0x26   : > { %p1234_p8 = pnand %p1233_p4, %p1227_p1 }
  0x28   : > { %1237 = shalt.err (!%p1234_p8)
}
  0x29   : > { %s1401_s16 = smov 128   ;;  %s1402_s17 = smov 8  }
  0x2a   : > { %1154 = dma.hbm_to_vmem [thread:$0]  (!%p1492_p11), %s1934_s1, 2048, %s1485_s28, [#allocation6], %s1401_s16, %s1401_s16, %s1402_s17  }
  0x2b   : > { %p31_p1 = scmp.eq.s32.totalorder %s30_s7, 0  ;;  %p40_p2 = scmp.ne.s32.totalorder %s1394_s20, %s1390_s19 }
  0x2c   : > { %p41_p4 = scmp.eq.s32.totalorder %s1398_s21, 0  ;;  %p1170_p6 = scmp.lt.s32.totalorder %s1398_s21, 2 }
  0x2d   : > { %s1531_s9 = scalar_select %p31_p1, %s1394_s20, %s33_s6  }
  0x2e   : > { %p42_p8 = por %p41_p4, %p40_p2  ;;  %p1946_p10 = scmp.eq.s32.totalorder %s1460_s22, 1 }
  0x2f   : > { %s206_s29 = sand.u32 1, %s1394_s20   ;;  %s961_s11 = sshll.u32 %s1398_s21, 12 }
  0x30   : > { %p1535_p12 = por %p1946_p10, %p40_p2  ;;  %s946_s12 = sshll.u32 %s206_s29, 8 }
  0x31   : > { %s1544_s15 = scalar_lea.hbm %s1933_s0, %s961_s11  ;;  %s210_s28 = scalar_lea.vmem [#allocation2], %s946_s12 }
  0x32   : > { %s217_s6 = sshll.u32 %s210_s28, 4  ;;  %p1546_p11 = pnand %p1170_p6, %p42_p8  ;;  %s1550_s6 = int_to_ptr.vmem [resolvable:$true] %s217_s6 }
  0x33   : > { %s1552_s27 = scalar_lea.sflag [#allocation3], %s206_s29  ;;  %s1238_s8 = scalar_lea.hbm %s1544_s15, 4096 }
  0x34   : > { %p1239_p13 = scmp.ne.s32.totalorder %s1544_s15, %s1238_s8  ;;  %p1240_p0 = pneg %p1546_p11 }
  0x35   : > { %s1243_s13 = scalar_lea.hbm %s1933_s0, 8192  ;;  %p1244_p7 = scmp.lt.u32.totalorder %s1544_s15, %s1933_s0 }
  0x36   : > { %p1241_p3 = pnand %p1240_p0, %p1239_p13  ;;  %p1245_p9 = scmp.lt.u32.totalorder %s1243_s13, %s1238_s8 }
  0x37   : > { %p1247_p2 = scmp.lt.u32.totalorder %s1238_s8, %s1544_s15 }
  0x38   : > { %p1242_p5 = pneg %p1241_p3  ;;  %p1246_p1 = por %p1245_p9, %p1244_p7 }
  0x3a   : > { %p1248_p4 = por %p1247_p2, %p1246_p1 }
  0x3c   : > { %p1249_p6 = pnand %p1248_p4, %p1242_p5 }
  0x3e   : > { %1252 = shalt.err (!%p1249_p6)
}
  0x3f   : > { %s1253_s29 = scalar_lea.vmem %s1550_s6, 4096  ;;  %s1403_s11 = smov [#allocation2]  }
  0x40   : > { %p1254_p8 = scmp.ne.s32.totalorder %s1550_s6, %s1253_s29  ;;  %s1258_s12 = sshll.u32 %s1403_s11, 4  ;;  %s1259_s12 = int_to_ptr.vmem [resolvable:$false] %s1258_s12 }
  0x41   : > { %s1260_s14 = scalar_lea.vmem %s1259_s12, 8192  ;;  %p1261_p3 = scmp.lt.s32.totalorder %s1550_s6, %s1259_s12 }
  0x42   : > { %p1256_p10 = pnand %p1254_p8, %p1240_p0  ;;  %p1262_p7 = scmp.lt.s32.totalorder %s1260_s14, %s1253_s29 }
  0x44   : > { %p1257_p13 = pneg %p1256_p10  ;;  %p1263_p9 = por %p1262_p7, %p1261_p3 }
  0x46   : > { %p1264_p1 = pnand %p1263_p9, %p1257_p13 }
  0x48   : > { %1267 = shalt.err (!%p1264_p1)
}
  0x49   : > { %1158 = dma.hbm_to_vmem [thread:$0]  (!%p1546_p11), %s1544_s15, 4096, %s1550_s6, %s1552_s27, %s1401_s16, %s1401_s16, %s1402_s17  }
  0x4a   : > { %p1949_p0 = scmp.ne.s32.totalorder %s1944_s26, 0 }
  0x4b   : > { %s1586_s8 = sand.u32 (!%p1949_p0), 1, %s1390_s19   ;;  %p1950_p5 = scmp.ne.s32.totalorder (!%p1949_p0), %s1942_s24, 0 }
  0x4c   : > { %229 = sbr.rel (%p1949_p0) target bundleno = 464 (0x1d0), region = 32  ;;  %s950_s13 = sshll.u32 (!%p1949_p0), %s1586_s8, 8 }
  0x4d   : > { %s232_s28 = scalar_lea.sflag (!%p1949_p0), [#allocation3], %s1586_s8  ;;  %s1592_s7 = scalar_lea.vmem (!%p1949_p0), [#allocation2], %s950_s13 }
  0x53   : > { %1369 = dma.done.wait (%p1950_p5), %s232_s28, 4096  }
  0x54   : > { %1371 = vsyncadd (%p1950_p5), %s232_s28, 4294963200  ;;  %p1951_p11 = scmp.eq.s32.totalorder %s1460_s22, 0 }
  0x56   : > { %1373 = dma.done.wait (%p1951_p11), [#allocation6], 2048   ;;  %p1952_p2 = pmov %p1951_p11 }
  0x57   : > { %v306_v0 = vld [vmem:[#allocation5] sm:$0xff]  ;;  %v307_v1 = vld [vmem:[#allocation5 + $0x8] sm:$0xff]  ;;  %v308_v2 = vld [vmem:[#allocation5 + $0x10] sm:$0xff]  ;;  %s1653_s16 = scalar_lea.vmem [#allocation7], %s950_s13  ;;  %s962_s17 = sshll.u32 %s1460_s22, 12 }
  0x58   : > { %1375 = vsyncadd (%p1952_p2), [#allocation6], 4294965248  ;;  %v1091_v3 = vpack.c.bf16 %v307_v1, %v306_v0  ;;  %v309_v4 = vld [vmem:[#allocation5 + $0x18] sm:$0xff]  ;;  %v310_v6 = vld [vmem:[#allocation5 + $0x20] sm:$0xff]  ;;  %s780_s15 = sshll.u32 %s1653_s16, 4  ;;  %s1766_s29 = scalar_lea.hbm %s1936_s3, %s962_s17  ;;  %s1768_s15 = int_to_ptr.vmem [resolvable:$true] %s780_s15 }
  0x59   : > { %v1095_v5 = vpack.c.bf16 %v309_v4, %v308_v2  ;;  %v311_v7 = vld [vmem:[#allocation5 + $0x28] sm:$0xff]  ;;  %v274_v9 = vld [vmem:[%s1592_s7] sm:$0xff]  ;;  %v312_v10 = vld [vmem:[#allocation5 + $0x30] sm:$0xff]  ;;  %s759_s11 = scalar_lea.sflag [#allocation4], %s1586_s8  ;;  %s1268_s12 = scalar_lea.vmem %s1768_s15, 4096 }
  0x5a   : > { %1092 = vmatprep.subr.bf16.mxu0 %v1091_v3  ;;  %1123 = vmatprep.subr.bf16.mxu1 %v1091_v3  ;;  %v1099_v8 = vpack.c.bf16 %v311_v7, %v310_v6  ;;  %v313_v11 = vld [vmem:[#allocation5 + $0x38] sm:$0xff]  ;;  %v314_v13 = vld [vmem:[#allocation5 + $0x40] sm:$0xff]  ;;  %v315_v14 = vld [vmem:[#allocation5 + $0x48] sm:$0xff]  ;;  %p1269_p4 = scmp.ne.s32.totalorder %s1768_s15, %s1268_s12  ;;  %s1404_s14 = smov [#allocation7]  }
  0x5b   : > { %1094 = vmatpush3.bf16.msra.mxu0 %v1091_v3  ;;  %1131 = vmatpush3.bf16.msra.mxu1 %v1091_v3  ;;  %v1103_v12 = vpack.c.bf16 %v313_v11, %v312_v10  ;;  %v290_v15 = vld [vmem:[%s1592_s7 + $0x80] sm:$0xff]  ;;  %v1107_v16 = vpack.c.bf16 %v315_v14, %v314_v13  ;;  %v316_v17 = vld [vmem:[#allocation5 + $0x50] sm:$0xff]  ;;  %v317_v18 = vld [vmem:[#allocation5 + $0x58] sm:$0xff]  ;;  %s1272_s13 = sshll.u32 %s1404_s14, 4  ;;  %s1273_s13 = int_to_ptr.vmem [resolvable:$false] %s1272_s13 }
  0x5c   : > { %1096 = vmatprep.subr.bf16.mxu0 %v1095_v5  ;;  %1124 = vmatprep.subr.bf16.mxu1 %v1095_v5  ;;  %v1111_v19 = vpack.c.bf16 %v317_v18, %v316_v17  ;;  %v318_v20 = vld [vmem:[#allocation5 + $0x60] sm:$0xff]  ;;  %v319_v21 = vld [vmem:[#allocation5 + $0x68] sm:$0xff]  ;;  %v320_v23 = vld [vmem:[#allocation5 + $0x70] sm:$0xff]  ;;  %p1270_p6 = pnand %p1269_p4, %p1535_p12  ;;  %s1274_s28 = scalar_lea.vmem %s1273_s13, 8192 }
  0x5d   : > { %1043 = vmatprep.mubr.f32.mxu0 %v274_v9  ;;  %1067 = vmatprep.mubr.f32.mxu1 %v290_v15  ;;  %v1115_v22 = vpack.c.bf16 %v319_v21, %v318_v20  ;;  %v321_v24 = vld [vmem:[#allocation5 + $0x78] sm:$0xff]  ;;  %v275_v26 = vld [vmem:[%s1592_s7 + $0x8] sm:$0xff]  ;;  %v276_v28 = vld [vmem:[%s1592_s7 + $0x10] sm:$0xff]  ;;  %p1275_p10 = scmp.lt.s32.totalorder %s1768_s15, %s1273_s13  ;;  %p1276_p13 = scmp.lt.s32.totalorder %s1274_s28, %s1268_s12 }
  0x5e   : > { %v1119_v25 = vpack.c.bf16 %v321_v24, %v320_v23  ;;  %v291_v27 = vld [vmem:[%s1592_s7 + $0x88] sm:$0xff]  ;;  %v292_v29 = vld [vmem:[%s1592_s7 + $0x90] sm:$0xff]  ;;  %v277_v30 = vld [vmem:[%s1592_s7 + $0x18] sm:$0xff]  ;;  %p1271_p8 = pneg %p1270_p6 }
  0x5f   : > { %1098 = vmatpush3.bf16.msra.mxu0 %v1095_v5  ;;  %1132 = vmatpush3.bf16.msra.mxu1 %v1095_v5  ;;  %v293_v31 = vld [vmem:[%s1592_s7 + $0x98] sm:$0xff]  ;;  %v278_v32 = vld [vmem:[%s1592_s7 + $0x20] sm:$0xff]  ;;  %v279_v34 = vld [vmem:[%s1592_s7 + $0x28] sm:$0xff]  ;;  %p1277_p3 = por %p1276_p13, %p1275_p10 }
  0x60   : > { %1100 = vmatprep.subr.bf16.mxu0 %v1099_v8  ;;  %1125 = vmatprep.subr.bf16.mxu1 %v1099_v8  ;;  %v294_v33 = vld [vmem:[%s1592_s7 + $0xa0] sm:$0xff]  ;;  %v295_v35 = vld [vmem:[%s1592_s7 + $0xa8] sm:$0xff]  ;;  %v280_v36 = vld [vmem:[%s1592_s7 + $0x30] sm:$0xff] }
  0x61   : > { %v296_v37 = vld [vmem:[%s1592_s7 + $0xb0] sm:$0xff]  ;;  %v281_v38 = vld [vmem:[%s1592_s7 + $0x38] sm:$0xff]  ;;  %v282_v40 = vld [vmem:[%s1592_s7 + $0x40] sm:$0xff]  ;;  %p1278_p7 = pnand %p1277_p3, %p1271_p8 }
  0x62   : > { %v297_v39 = vld [vmem:[%s1592_s7 + $0xb8] sm:$0xff]  ;;  %v298_v41 = vld [vmem:[%s1592_s7 + $0xc0] sm:$0xff]  ;;  %v283_v42 = vld [vmem:[%s1592_s7 + $0x48] sm:$0xff] }
  0x63   : > { %1102 = vmatpush3.bf16.msra.mxu0 %v1099_v8  ;;  %1133 = vmatpush3.bf16.msra.mxu1 %v1099_v8  ;;  %v299_v43 = vld [vmem:[%s1592_s7 + $0xc8] sm:$0xff]  ;;  %v284_v44 = vld [vmem:[%s1592_s7 + $0x50] sm:$0xff]  ;;  %v285_v46 = vld [vmem:[%s1592_s7 + $0x58] sm:$0xff] }
  0x64   : > { %1104 = vmatprep.subr.bf16.mxu0 %v1103_v12  ;;  %1126 = vmatprep.subr.bf16.mxu1 %v1103_v12  ;;  %v300_v45 = vld [vmem:[%s1592_s7 + $0xd0] sm:$0xff]  ;;  %v301_v47 = vld [vmem:[%s1592_s7 + $0xd8] sm:$0xff]  ;;  %v286_v48 = vld [vmem:[%s1592_s7 + $0x60] sm:$0xff] }
  0x65   : > { %v302_v49 = vld [vmem:[%s1592_s7 + $0xe0] sm:$0xff]  ;;  %v287_v50 = vld [vmem:[%s1592_s7 + $0x68] sm:$0xff]  ;;  %v288_v52 = vld [vmem:[%s1592_s7 + $0x70] sm:$0xff] }
  0x66   : > { %v303_v51 = vld [vmem:[%s1592_s7 + $0xe8] sm:$0xff]  ;;  %v304_v53 = vld [vmem:[%s1592_s7 + $0xf0] sm:$0xff]  ;;  %v289_v54 = vld [vmem:[%s1592_s7 + $0x78] sm:$0xff] }
  0x67   : > { %1106 = vmatpush3.bf16.msra.mxu0 %v1103_v12  ;;  %1134 = vmatpush3.bf16.msra.mxu1 %v1103_v12  ;;  %v305_v55 = vld [vmem:[%s1592_s7 + $0xf8] sm:$0xff]  ;;  %v1637_v56 = vld [vmem:[%s1935_s2] ss:$0 sm:$0xff] }
  0x68   : > { %1108 = vmatprep.subr.bf16.mxu0 %v1107_v16  ;;  %1127 = vmatprep.subr.bf16.mxu1 %v1107_v16 }
  0x6b   : > { %1110 = vmatpush3.bf16.msra.mxu0 %v1107_v16  ;;  %1135 = vmatpush3.bf16.msra.mxu1 %v1107_v16 }
  0x6c   : > { %1112 = vmatprep.subr.bf16.mxu0 %v1111_v19  ;;  %1128 = vmatprep.subr.bf16.mxu1 %v1111_v19 }
  0x6f   : > { %1114 = vmatpush3.bf16.msra.mxu0 %v1111_v19  ;;  %1136 = vmatpush3.bf16.msra.mxu1 %v1111_v19 }
  0x70   : > { %1116 = vmatprep.subr.bf16.mxu0 %v1115_v22  ;;  %1129 = vmatprep.subr.bf16.mxu1 %v1115_v22 }
  0x73   : > { %1118 = vmatpush3.bf16.msra.mxu0 %v1115_v22  ;;  %1137 = vmatpush3.bf16.msra.mxu1 %v1115_v22 }
  0x74   : > { %1120 = vmatprep.subr.bf16.mxu0 %v1119_v25  ;;  %1130 = vmatprep.subr.bf16.mxu1 %v1119_v25 }
  0x77   : > { %1122 = vmatpush3.bf16.msra.mxu0 %v1119_v25  ;;  %1138 = vmatpush3.bf16.msra.mxu1 %v1119_v25 }
  0x7a   : > { %1044 = vmatmul.mubr.f32.vlgmr.msra.gmra.mrb[0].mxu0 %v275_v26  ;;  %1068 = vmatmul.mubr.f32.vlgmr.msra.gmra.mrb[0].mxu1 %v291_v27 }
  0x7b   : > { %1046 = vmatprep.mubr.f32.mxu0 %v276_v28  ;;  %1070 = vmatprep.mubr.f32.mxu1 %v292_v29 }
  0x7e   : > { %1047 = vmatmul.mubr.f32.gmra.mrb[2].mxu0 %v277_v30  ;;  %1071 = vmatmul.mubr.f32.gmra.mrb[2].mxu1 %v293_v31 }
  0x7f   : > { %1049 = vmatprep.mubr.f32.mxu0 %v278_v32  ;;  %1073 = vmatprep.mubr.f32.mxu1 %v294_v33 }
  0x82   : > { %1050 = vmatmul.mubr.f32.gmra.mrb[4].mxu0 %v279_v34  ;;  %1074 = vmatmul.mubr.f32.gmra.mrb[4].mxu1 %v295_v35 }
  0x83   : > { %1052 = vmatprep.mubr.f32.mxu0 %v280_v36  ;;  %1076 = vmatprep.mubr.f32.mxu1 %v296_v37 }
  0x86   : > { %1053 = vmatmul.mubr.f32.gmra.mrb[6].mxu0 %v281_v38  ;;  %1077 = vmatmul.mubr.f32.gmra.mrb[6].mxu1 %v297_v39 }
  0x87   : > { %1055 = vmatprep.mubr.f32.mxu0 %v282_v40  ;;  %1079 = vmatprep.mubr.f32.mxu1 %v298_v41 }
  0x8a   : > { %1056 = vmatmul.mubr.f32.gmra.mrb[8].mxu0 %v283_v42  ;;  %1080 = vmatmul.mubr.f32.gmra.mrb[8].mxu1 %v299_v43 }
  0x8b   : > { %1058 = vmatprep.mubr.f32.mxu0 %v284_v44  ;;  %1082 = vmatprep.mubr.f32.mxu1 %v300_v45 }
  0x8e   : > { %1059 = vmatmul.mubr.f32.gmra.mrb[10].mxu0 %v285_v46  ;;  %1083 = vmatmul.mubr.f32.gmra.mrb[10].mxu1 %v301_v47 }
  0x8f   : > { %1061 = vmatprep.mubr.f32.mxu0 %v286_v48  ;;  %1085 = vmatprep.mubr.f32.mxu1 %v302_v49 }
  0x92   : > { %1062 = vmatmul.mubr.f32.gmra.mrb[12].mxu0 %v287_v50  ;;  %1086 = vmatmul.mubr.f32.gmra.mrb[12].mxu1 %v303_v51 }
  0x93   : > { %1064 = vmatprep.mubr.f32.mxu0 %v288_v52  ;;  %1088 = vmatprep.mubr.f32.mxu1 %v304_v53 }
  0x96   : > { %1065 = vmatmul.mubr.f32.gmra.mrb[14].mxu0 %v289_v54  ;;  %1089 = vmatmul.mubr.f32.gmra.mrb[14].mxu1 %v305_v55 }
 0x14d   : > { %v1045_v57 = vpop.f32.mrb[0].mxu0  ;;  %v1069_v58 = vpop.f32.mrb[0].mxu1 }
 0x14e   : > { %v401_v59 = vadd.f32 %v1045_v57, %v1637_v56  ;;  %v395_v60 = vpop.f32.mrb[1].mxu0  ;;  %v481_v61 = vadd.f32 %v1069_v58, %v1637_v56  ;;  %v475_v62 = vpop.f32.mrb[1].mxu1 }
 0x14f   : > { %v396_v63 = vadd.f32 %v1637_v56, %v395_v60  ;;  %v476_v0 = vadd.f32 %v1637_v56, %v475_v62 }
 0x150   : > { %v555_v1 = vmax.f32 %v401_v59, 0.0  ;;  %v571_v2 = vmax.f32 %v481_v61, 0.0 }
 0x151   : > { %v554_v3 = vmax.f32 %v396_v63, 0.0  ;;  %v1048_v4 = vpop.f32.mrb[2].mxu0  ;;  %v570_v5 = vmax.f32 %v476_v0, 0.0  ;;  %v1072_v6 = vpop.f32.mrb[2].mxu1 }
 0x152   : > { %v587_v7 = vmin.f32 %v555_v1, 6.0  ;;  %v411_v8 = vadd.f32 %v1048_v4, %v1637_v56  ;;  %v405_v9 = vpop.f32.mrb[3].mxu0  ;;  %v1644_v10 = vmin.f32 %v571_v2, 6.0  ;;  %v491_v11 = vadd.f32 %v1072_v6, %v1637_v56  ;;  %v485_v12 = vpop.f32.mrb[3].mxu1 }
 0x153   : > { %v586_v13 = vmin.f32 %v554_v3, 6.0  ;;  %v406_v14 = vadd.f32 %v1637_v56, %v405_v9  ;;  %v1648_v15 = vmin.f32 %v570_v5, 6.0  ;;  %v486_v16 = vadd.f32 %v1637_v56, %v485_v12 }
 0x154   : > { %619 = vst [vmem:[%s1653_s16 + $0x8] sm:$0xff] %v587_v7  ;;  %v689_v17 = vmul.f32 %v587_v7, %v587_v7  ;;  %v557_v18 = vmax.f32 %v411_v8, 0.0  ;;  %635 = vst [vmem:[%s1653_s16 + $0x88] sm:$0xff] %v1644_v10  ;;  %v573_v19 = vmax.f32 %v491_v11, 0.0 }
 0x155   : > { %618 = vst [vmem:[%s1653_s16] sm:$0xff] %v586_v13  ;;  %v650_v20 = vadd.f32 %v587_v7, %v586_v13  ;;  %v688_v21 = vmul.f32 %v586_v13, %v586_v13  ;;  %v556_v22 = vmax.f32 %v406_v14, 0.0  ;;  %v1051_v23 = vpop.f32.mrb[4].mxu0  ;;  %634 = vst [vmem:[%s1653_s16 + $0x80] sm:$0xff] %v1648_v15  ;;  %v1075_v24 = vpop.f32.mrb[4].mxu1  ;;  %v572_v29 = vmax.f32 %v486_v16, 0.0 }
 0x156   : > { %v589_v25 = vmin.f32 %v557_v18, 6.0  ;;  %v421_v26 = vadd.f32 %v1051_v23, %v1637_v56  ;;  %v415_v27 = vpop.f32.mrb[5].mxu0  ;;  %v1662_v28 = vmin.f32 %v573_v19, 6.0  ;;  %v495_v30 = vpop.f32.mrb[5].mxu1  ;;  %v501_v34 = vadd.f32 %v1075_v24, %v1637_v56 }
 0x157   : > { %v720_v31 = vadd.f32 %v689_v17, %v688_v21  ;;  %v588_v32 = vmin.f32 %v556_v22, 6.0  ;;  %v416_v33 = vadd.f32 %v1637_v56, %v415_v27  ;;  %v1669_v36 = vmin.f32 %v572_v29, 6.0 }
 0x158   : > { %621 = vst [vmem:[%s1653_s16 + $0x18] sm:$0xff] %v589_v25  ;;  %v559_v35 = vmax.f32 %v421_v26, 0.0  ;;  %637 = vst [vmem:[%s1653_s16 + $0x98] sm:$0xff] %v1662_v28  ;;  %v575_v41 = vmax.f32 %v501_v34, 0.0  ;;  %v691_v43 = vmul.f32 %v589_v25, %v589_v25  ;;  %v496_v47 = vadd.f32 %v1637_v56, %v495_v30 }
 0x159   : > { %620 = vst [vmem:[%s1653_s16 + $0x10] sm:$0xff] %v588_v32  ;;  %v651_v37 = vadd.f32 %v650_v20, %v588_v32  ;;  %v690_v38 = vmul.f32 %v588_v32, %v588_v32  ;;  %v558_v39 = vmax.f32 %v416_v33, 0.0  ;;  %v1054_v40 = vpop.f32.mrb[6].mxu0  ;;  %v1078_v42 = vpop.f32.mrb[6].mxu1  ;;  %636 = vst [vmem:[%s1653_s16 + $0x90] sm:$0xff] %v1669_v36 }
 0x15a   : > { %v591_v44 = vmin.f32 %v559_v35, 6.0  ;;  %v431_v45 = vadd.f32 %v1054_v40, %v1637_v56  ;;  %v425_v46 = vpop.f32.mrb[7].mxu0  ;;  %v505_v48 = vpop.f32.mrb[7].mxu1  ;;  %v1678_v54 = vmin.f32 %v575_v41, 6.0  ;;  %v574_v55 = vmax.f32 %v496_v47, 0.0 }
 0x15b   : > { %v721_v49 = vadd.f32 %v720_v31, %v690_v38  ;;  %v590_v50 = vmin.f32 %v558_v39, 6.0  ;;  %v652_v51 = vadd.f32 %v651_v37, %v589_v25  ;;  %v426_v52 = vadd.f32 %v1637_v56, %v425_v46 }
 0x15c   : > { %623 = vst [vmem:[%s1653_s16 + $0x28] sm:$0xff] %v591_v44  ;;  %v561_v53 = vmax.f32 %v431_v45, 0.0  ;;  %v693_v63 = vmul.f32 %v591_v44, %v591_v44  ;;  %639 = vst [vmem:[%s1653_s16 + $0xa8] sm:$0xff] %v1678_v54  ;;  %v1684_v3 = vmin.f32 %v574_v55, 6.0  ;;  %v511_v12 = vadd.f32 %v1078_v42, %v1637_v56 }
 0x15d   : > { %622 = vst [vmem:[%s1653_s16 + $0x20] sm:$0xff] %v590_v50  ;;  %v653_v57 = vadd.f32 %v652_v51, %v590_v50  ;;  %v692_v58 = vmul.f32 %v590_v50, %v590_v50  ;;  %v722_v59 = vadd.f32 %v721_v49, %v691_v43  ;;  %v560_v60 = vmax.f32 %v426_v52, 0.0  ;;  %v1057_v61 = vpop.f32.mrb[8].mxu0  ;;  %v1081_v62 = vpop.f32.mrb[8].mxu1 }
 0x15e   : > { %v593_v0 = vmin.f32 %v561_v53, 6.0  ;;  %v441_v1 = vadd.f32 %v1057_v61, %v1637_v56  ;;  %v435_v2 = vpop.f32.mrb[9].mxu0  ;;  %v1686_v4 = vpop.f32.mrb[9].mxu1  ;;  %638 = vst [vmem:[%s1653_s16 + $0xa0] sm:$0xff] %v1684_v3  ;;  %v577_v23 = vmax.f32 %v511_v12, 0.0  ;;  %v506_v24 = vadd.f32 %v1637_v56, %v505_v48 }
 0x15f   : > { %v723_v5 = vadd.f32 %v722_v59, %v692_v58  ;;  %v592_v6 = vmin.f32 %v560_v60, 6.0  ;;  %v654_v7 = vadd.f32 %v653_v57, %v591_v44  ;;  %v436_v8 = vadd.f32 %v1637_v56, %v435_v2 }
 0x160   : > { %625 = vst [vmem:[%s1653_s16 + $0x38] sm:$0xff] %v593_v0  ;;  %v695_v9 = vmul.f32 %v593_v0, %v593_v0  ;;  %v563_v11 = vmax.f32 %v441_v1, 0.0  ;;  %v1702_v32 = vmin.f32 %v577_v23, 6.0  ;;  %v576_v33 = vmax.f32 %v506_v24, 0.0 }
 0x161   : > { %624 = vst [vmem:[%s1653_s16 + $0x30] sm:$0xff] %v592_v6  ;;  %v655_v13 = vadd.f32 %v654_v7, %v592_v6  ;;  %v694_v14 = vmul.f32 %v592_v6, %v592_v6  ;;  %v724_v16 = vadd.f32 %v723_v5, %v693_v63  ;;  %v562_v17 = vmax.f32 %v436_v8, 0.0  ;;  %v1060_v18 = vpop.f32.mrb[10].mxu0  ;;  %v1694_v19 = vpop.f32.mrb[10].mxu1 }
 0x162   : > { %v595_v20 = vmin.f32 %v563_v11, 6.0  ;;  %v451_v21 = vadd.f32 %v1060_v18, %v1637_v56  ;;  %v445_v22 = vpop.f32.mrb[11].mxu0  ;;  %v1698_v25 = vpop.f32.mrb[11].mxu1  ;;  %641 = vst [vmem:[%s1653_s16 + $0xb8] sm:$0xff] %v1702_v32  ;;  %v1708_v45 = vmin.f32 %v576_v33, 6.0  ;;  %v521_v53 = vadd.f32 %v1081_v62, %v1637_v56 }
 0x163   : > { %v725_v26 = vadd.f32 %v724_v16, %v694_v14  ;;  %v594_v27 = vmin.f32 %v562_v17, 6.0  ;;  %v656_v29 = vadd.f32 %v655_v13, %v593_v0  ;;  %v446_v30 = vadd.f32 %v1637_v56, %v445_v22 }
 0x164   : > { %627 = vst [vmem:[%s1653_s16 + $0x48] sm:$0xff] %v595_v20  ;;  %v565_v31 = vmax.f32 %v451_v21, 0.0  ;;  %v697_v41 = vmul.f32 %v595_v20, %v595_v20  ;;  %640 = vst [vmem:[%s1653_s16 + $0xb0] sm:$0xff] %v1708_v45  ;;  %v579_v2 = vmax.f32 %v521_v53, 0.0  ;;  %v516_v5 = vadd.f32 %v1637_v56, %v1686_v4 }
 0x165   : > { %626 = vst [vmem:[%s1653_s16 + $0x40] sm:$0xff] %v594_v27  ;;  %v657_v34 = vadd.f32 %v656_v29, %v594_v27  ;;  %v696_v35 = vmul.f32 %v594_v27, %v594_v27  ;;  %v726_v37 = vadd.f32 %v725_v26, %v695_v9  ;;  %v564_v38 = vmax.f32 %v446_v30, 0.0  ;;  %v1063_v39 = vpop.f32.mrb[12].mxu0  ;;  %v1087_v40 = vpop.f32.mrb[12].mxu1 }
 0x166   : > { %v597_v42 = vmin.f32 %v565_v31, 6.0  ;;  %v461_v43 = vadd.f32 %v1063_v39, %v1637_v56  ;;  %v455_v44 = vpop.f32.mrb[13].mxu0  ;;  %v535_v46 = vpop.f32.mrb[13].mxu1  ;;  %v1721_v12 = vmin.f32 %v579_v2, 6.0  ;;  %v578_v13 = vmax.f32 %v516_v5, 0.0 }
 0x167   : > { %v727_v47 = vadd.f32 %v726_v37, %v696_v35  ;;  %v596_v48 = vmin.f32 %v564_v38, 6.0  ;;  %v658_v49 = vadd.f32 %v657_v34, %v595_v20  ;;  %v456_v50 = vadd.f32 %v1637_v56, %v455_v44 }
 0x168   : > { %629 = vst [vmem:[%s1653_s16 + $0x58] sm:$0xff] %v597_v42  ;;  %v699_v51 = vmul.f32 %v597_v42, %v597_v42  ;;  %v567_v52 = vmax.f32 %v461_v43, 0.0  ;;  %643 = vst [vmem:[%s1653_s16 + $0xc8] sm:$0xff] %v1721_v12  ;;  %v1726_v21 = vmin.f32 %v578_v13, 6.0  ;;  %v531_v22 = vadd.f32 %v1694_v19, %v1637_v56 }
 0x169   : > { %628 = vst [vmem:[%s1653_s16 + $0x50] sm:$0xff] %v596_v48  ;;  %v659_v55 = vadd.f32 %v658_v49, %v596_v48  ;;  %v698_v57 = vmul.f32 %v596_v48, %v596_v48  ;;  %v728_v58 = vadd.f32 %v727_v47, %v697_v41  ;;  %v566_v59 = vmax.f32 %v456_v50, 0.0  ;;  %v1066_v60 = vpop.f32.mrb[14].mxu0  ;;  %v1090_v61 = vpop.f32.mrb[14].mxu1 }
 0x16a   : > { %v599_v63 = vmin.f32 %v567_v52, 6.0  ;;  %v471_v0 = vadd.f32 %v1066_v60, %v1637_v56  ;;  %v465_v1 = vpop.f32.mrb[15].mxu0  ;;  %v545_v6 = vpop.f32.mrb[15].mxu1  ;;  %v526_v27 = vadd.f32 %v1637_v56, %v1698_v25  ;;  %v704_v30 = vmul.f32 %v1648_v15, %v1648_v15  ;;  %642 = vst [vmem:[%s1653_s16 + $0xc0] sm:$0xff] %v1726_v21 }
 0x16b   : > { %v729_v62 = vadd.f32 %v728_v58, %v698_v57  ;;  %v598_v7 = vmin.f32 %v566_v59, 6.0  ;;  %v660_v8 = vadd.f32 %v659_v55, %v597_v42  ;;  %v466_v9 = vadd.f32 %v1637_v56, %v465_v1 }
 0x16c   : > { %631 = vst [vmem:[%s1653_s16 + $0x68] sm:$0xff] %v599_v63  ;;  %v569_v11 = vmax.f32 %v471_v0, 0.0  ;;  %v701_v4 = vmul.f32 %v599_v63, %v599_v63  ;;  %v581_v31 = vmax.f32 %v531_v22, 0.0  ;;  %v541_v33 = vadd.f32 %v1087_v40, %v1637_v56 }
 0x16d   : > { %630 = vst [vmem:[%s1653_s16 + $0x60] sm:$0xff] %v598_v7  ;;  %v661_v14 = vadd.f32 %v660_v8, %v598_v7  ;;  %v700_v16 = vmul.f32 %v598_v7, %v598_v7  ;;  %v730_v17 = vadd.f32 %v729_v62, %v699_v51  ;;  %v568_v18 = vmax.f32 %v466_v9, 0.0 }
 0x16e   : > { %v601_v20 = vmin.f32 %v569_v11, 6.0  ;;  %v580_v37 = vmax.f32 %v526_v27, 0.0  ;;  %v1739_v38 = vmin.f32 %v581_v31, 6.0  ;;  %v583_v25 = vmax.f32 %v541_v33, 0.0 }
 0x16f   : > { %v731_v23 = vadd.f32 %v730_v17, %v700_v16  ;;  %v600_v24 = vmin.f32 %v568_v18, 6.0  ;;  %v662_v26 = vadd.f32 %v661_v14, %v599_v63  ;;  %v536_v39 = vadd.f32 %v1637_v56, %v535_v46 }
 0x170   : > { %633 = vst [vmem:[%s1653_s16 + $0x78] sm:$0xff] %v601_v20  ;;  %v703_v29 = vmul.f32 %v601_v20, %v601_v20  ;;  %v551_v41 = vadd.f32 %v1090_v61, %v1637_v56  ;;  %v1743_v44 = vmin.f32 %v580_v37, 6.0  ;;  %v546_v40 = vadd.f32 %v1637_v56, %v545_v6  ;;  %645 = vst [vmem:[%s1653_s16 + $0xd8] sm:$0xff] %v1739_v38 }
 0x171   : > { %632 = vst [vmem:[%s1653_s16 + $0x70] sm:$0xff] %v600_v24  ;;  %v663_v19 = vadd.f32 %v662_v26, %v600_v24  ;;  %v702_v34 = vmul.f32 %v600_v24, %v600_v24  ;;  %v732_v35 = vadd.f32 %v731_v23, %v701_v4  ;;  %v1750_v47 = vmin.f32 %v583_v25, 6.0 }
 0x172   : > { %v582_v48 = vmax.f32 %v536_v39, 0.0  ;;  %v585_v49 = vmax.f32 %v551_v41, 0.0  ;;  %644 = vst [vmem:[%s1653_s16 + $0xd0] sm:$0xff] %v1743_v44  ;;  %v584_v51 = vmax.f32 %v546_v40, 0.0  ;;  %v705_v56 = vmul.f32 %v1644_v10, %v1644_v10 }
 0x173   : > { %v733_v42 = vadd.f32 %v732_v35, %v702_v34  ;;  %v664_v43 = vadd.f32 %v663_v19, %v601_v20  ;;  %647 = vst [vmem:[%s1653_s16 + $0xe8] sm:$0xff] %v1750_v47  ;;  %v706_v57 = vmul.f32 %v1669_v36, %v1669_v36 }
 0x174   : > { %v1759_v52 = vmin.f32 %v582_v48, 6.0  ;;  %v1761_v53 = vmin.f32 %v585_v49, 6.0  ;;  %v1773_v58 = vmin.f32 %v584_v51, 6.0 }
 0x175   : > { %v665_v46 = vadd.f32 %v664_v43, %v1648_v15  ;;  %v734_v50 = vadd.f32 %v733_v42, %v703_v29 }
 0x176   : > { %646 = vst [vmem:[%s1653_s16 + $0xe0] sm:$0xff] %v1759_v52  ;;  %649 = vst [vmem:[%s1653_s16 + $0xf8] sm:$0xff] %v1761_v53 }
 0x177   : > { %v735_v15 = vadd.f32 %v734_v50, %v704_v30  ;;  %v666_v55 = vadd.f32 %v665_v46, %v1644_v10  ;;  %648 = vst [vmem:[%s1653_s16 + $0xf0] sm:$0xff] %v1773_v58 }
 0x179   : > { %v667_v59 = vadd.f32 %v666_v55, %v1669_v36  ;;  %v736_v60 = vadd.f32 %v735_v15, %v705_v56 }
 0x17a   : > { %1281 = shalt.err (!%p1278_p7)
}
 0x17b   : > { %s1282_s7 = scalar_lea.hbm %s1766_s29, 4096  ;;  %s1286_s16 = scalar_lea.hbm %s1936_s3, 8192 }
 0x17c   : > { %p1283_p9 = scmp.ne.s32.totalorder %s1766_s29, %s1282_s7  ;;  %p1287_p5 = scmp.lt.u32.totalorder %s1766_s29, %s1936_s3 }
 0x17d   : > { %p1288_p11 = scmp.lt.u32.totalorder %s1286_s16, %s1282_s7  ;;  %p1290_p4 = scmp.lt.u32.totalorder %s1282_s7, %s1766_s29 }
 0x17e   : > { %p1284_p1 = pnand %p1283_p9, %p1535_p12 }
 0x17f   : > { %p1289_p2 = por %p1288_p11, %p1287_p5 }
 0x180   : > { %p1285_p0 = pneg %p1284_p1 }
 0x181   : > { %p1291_p6 = por %p1290_p4, %p1289_p2 }
 0x183   : > { %p1292_p8 = pnand %p1291_p6, %p1285_p0 }
 0x185   : > { %1295 = shalt.err (!%p1292_p8)
}
 0x186   : > { %s1405_s27 = smov 128   ;;  %s1406_s12 = smov 8   ;;  %v707_v10 = vmul.f32 %v1662_v28, %v1662_v28  ;;  %v737_v36 = vadd.f32 %v736_v60, %v706_v57  ;;  %v668_v61 = vadd.f32 %v667_v59, %v1662_v28  ;;  %v708_v63 = vmul.f32 %v1684_v3, %v1684_v3 }
 0x187   : > { %1145 = dma.vmem_to_hbm [thread:$0]  (%p1535_p12), %s1768_s15, 4096, %s1766_s29, %s759_s11, %s1405_s27, %s1405_s27, %s1406_s12   ;;  %v709_v2 = vmul.f32 %v1678_v54, %v1678_v54  ;;  %v710_v62 = vmul.f32 %v1708_v45, %v1708_v45  ;;  %v711_v28 = vmul.f32 %v1702_v32, %v1702_v32  ;;  %v718_v29 = vmul.f32 %v1773_v58, %v1773_v58 }
 0x188   : > { %v669_v0 = vadd.f32 %v668_v61, %v1684_v3  ;;  %v738_v1 = vadd.f32 %v737_v36, %v707_v10  ;;  %v712_v3 = vmul.f32 %v1726_v21, %v1726_v21  ;;  %v719_v33 = vmul.f32 %v1761_v53, %v1761_v53  ;;  %s763_s15 = sand.u32 1, %s1460_s22   ;;  %s957_s29 = sshll.u32 %s1460_s22, 4 }
 0x189   : > { %s267_s11 = scalar_lea.vmem [#allocation8], %s1586_s8  ;;  %s273_s13 = scalar_lea.vmem [#allocation10], %s1586_s8 }
 0x18a   : > { %v739_v5 = vadd.f32 %v738_v1, %v708_v63  ;;  %v670_v6 = vadd.f32 %v669_v0, %v1678_v54  ;;  %v713_v54 = vmul.f32 %v1721_v12, %v1721_v12  ;;  %s796_s14 = sshll.u32 %s267_s11, 4  ;;  %s809_s28 = sshll.u32 %s273_s13, 4  ;;  %s1856_s14 = int_to_ptr.vmem [resolvable:$true] %s796_s14  ;;  %s1863_s28 = int_to_ptr.vmem [resolvable:$true] %s809_s28 }
 0x18b   : > { %s1854_s26 = scalar_lea.hbm %s1937_s4, %s957_s29  ;;  %s1861_s17 = scalar_lea.hbm %s1938_s5, %s957_s29 }
 0x18c   : > { %v671_v7 = vadd.f32 %v670_v6, %v1708_v45  ;;  %v740_v8 = vadd.f32 %v739_v5, %v709_v2  ;;  %v714_v45 = vmul.f32 %v1743_v44, %v1743_v44  ;;  %s1865_s6 = scalar_lea.sflag [#allocation9], %s763_s15  ;;  %s1296_s27 = scalar_lea.vmem %s1856_s14, 16 }
 0x18d   : > { %p1297_p10 = scmp.ne.s32.totalorder %s1856_s14, %s1296_s27  ;;  %s1407_s12 = smov [#allocation8]  }
 0x18e   : > { %v741_v9 = vadd.f32 %v740_v8, %v710_v62  ;;  %v672_v11 = vadd.f32 %v671_v7, %v1702_v32  ;;  %v715_v32 = vmul.f32 %v1739_v38, %v1739_v38  ;;  %s1300_s7 = sshll.u32 %s1407_s12, 4  ;;  %s1301_s7 = int_to_ptr.vmem [resolvable:$false] %s1300_s7 }
 0x18f   : > { %p1298_p13 = pnand %p1297_p10, %p1535_p12  ;;  %s1302_s24 = scalar_lea.vmem %s1301_s7, 32 }
 0x190   : > { %v673_v13 = vadd.f32 %v672_v11, %v1726_v21  ;;  %v742_v14 = vadd.f32 %v741_v9, %v711_v28  ;;  %v716_v21 = vmul.f32 %v1759_v52, %v1759_v52  ;;  %p1303_p7 = scmp.lt.s32.totalorder %s1856_s14, %s1301_s7  ;;  %p1304_p9 = scmp.lt.s32.totalorder %s1302_s24, %s1296_s27 }
 0x191   : > { %p1299_p3 = pneg %p1298_p13 }
 0x192   : > { %v743_v16 = vadd.f32 %v742_v14, %v712_v3  ;;  %v674_v17 = vadd.f32 %v673_v13, %v1721_v12  ;;  %v717_v12 = vmul.f32 %v1750_v47, %v1750_v47  ;;  %p1305_p1 = por %p1304_p9, %p1303_p7 }
 0x194   : > { %v675_v18 = vadd.f32 %v674_v17, %v1743_v44  ;;  %v744_v4 = vadd.f32 %v743_v16, %v713_v54  ;;  %p1306_p0 = pnand %p1305_p1, %p1299_p3 }
 0x196   : > { %v745_v20 = vadd.f32 %v744_v4, %v714_v45  ;;  %v676_v22 = vadd.f32 %v675_v18, %v1739_v38 }
 0x198   : > { %v677_v23 = vadd.f32 %v676_v22, %v1759_v52  ;;  %v746_v24 = vadd.f32 %v745_v20, %v715_v32 }
 0x19a   : > { %v747_v26 = vadd.f32 %v746_v24, %v716_v21  ;;  %v678_v27 = vadd.f32 %v677_v23, %v1750_v47 }
 0x19c   : > { %v679_v30 = vadd.f32 %v678_v27, %v1773_v58  ;;  %v748_v31 = vadd.f32 %v747_v26, %v717_v12 }
 0x19e   : > { %v680_v19 = vadd.f32 %v679_v30, %v1761_v53  ;;  %v749_v34 = vadd.f32 %v748_v31, %v718_v29 }
 0x1a0   : > { %v681_v35 = vrot.slane %v680_v19, 4  ;;  %v750_v37 = vadd.f32 %v749_v34, %v719_v33 }
 0x1a2   : > { %v682_v38 = vadd.f32 %v681_v35, %v680_v19  ;;  %v751_v25 = vrot.slane %v750_v37, 4 }
 0x1a4   : > { %v683_v39 = vrot.slane %v682_v38, 2  ;;  %v752_v41 = vadd.f32 %v751_v25, %v750_v37 }
 0x1a6   : > { %v684_v42 = vadd.f32 %v683_v39, %v682_v38  ;;  %v753_v43 = vrot.slane %v752_v41, 2 }
 0x1a8   : > { %v754_v44 = vadd.f32 %v753_v43, %v752_v41  ;;  %v685_v40 = vrot.slane %v684_v42, 1 }
 0x1aa   : > { %v686_v47 = vadd.f32 %v685_v40, %v684_v42  ;;  %v755_v48 = vrot.slane %v754_v44, 1 }
 0x1ac   : > { %687 = vst [vmem:[%s267_s11] sm:$0x1] %v686_v47  ;;  %v756_v49 = vadd.f32 %v755_v48, %v754_v44 }
 0x1ad   : > { %1309 = shalt.err (!%p1306_p0)
}
 0x1ae   : > { %s1310_s15 = scalar_lea.hbm %s1854_s26, 16  ;;  %s1314_s22 = scalar_lea.hbm %s1937_s4, 32 }
 0x1af   : > { %p1311_p5 = scmp.ne.s32.totalorder %s1854_s26, %s1310_s15  ;;  %p1315_p4 = scmp.lt.u32.totalorder %s1854_s26, %s1937_s4 }
 0x1b0   : > { %p1316_p6 = scmp.lt.u32.totalorder %s1314_s22, %s1310_s15  ;;  %p1318_p10 = scmp.lt.u32.totalorder %s1310_s15, %s1854_s26 }
 0x1b1   : > { %p1312_p11 = pnand %p1311_p5, %p1535_p12 }
 0x1b2   : > { %p1317_p8 = por %p1316_p6, %p1315_p4 }
 0x1b3   : > { %p1313_p2 = pneg %p1312_p11 }
 0x1b4   : > { %p1319_p13 = por %p1318_p10, %p1317_p8 }
 0x1b6   : > { %p1320_p3 = pnand %p1319_p13, %p1313_p2 }
 0x1b8   : > { %1323 = shalt.err (!%p1320_p3)
}
 0x1b9   : > { %1146 = dma.vmem_to_hbm [thread:$0]  (%p1535_p12), %s1856_s14, 16, %s1854_s26, %s1865_s6   ;;  %757 = vst [vmem:[%s273_s13] sm:$0x1] %v756_v49 }
 0x1ba   : > { %s1324_s27 = scalar_lea.vmem %s1863_s28, 16  ;;  %s1408_s7 = smov [#allocation10]  }
 0x1bb   : > { %p1325_p7 = scmp.ne.s32.totalorder %s1863_s28, %s1324_s27  ;;  %s1328_s24 = sshll.u32 %s1408_s7, 4  ;;  %s1329_s24 = int_to_ptr.vmem [resolvable:$false] %s1328_s24 }
 0x1bc   : > { %s1330_s15 = scalar_lea.vmem %s1329_s24, 32  ;;  %p1331_p0 = scmp.lt.s32.totalorder %s1863_s28, %s1329_s24 }
 0x1bd   : > { %p1326_p9 = pnand %p1325_p7, %p1535_p12  ;;  %p1332_p5 = scmp.lt.s32.totalorder %s1330_s15, %s1324_s27 }
 0x1bf   : > { %p1327_p1 = pneg %p1326_p9  ;;  %p1333_p11 = por %p1332_p5, %p1331_p0 }
 0x1c1   : > { %p1334_p2 = pnand %p1333_p11, %p1327_p1 }
 0x1c3   : > { %1337 = shalt.err (!%p1334_p2)
}
 0x1c4   : > { %s1338_s8 = scalar_lea.hbm %s1861_s17, 16  ;;  %s1342_s26 = scalar_lea.hbm %s1938_s5, 32 }
 0x1c5   : > { %p1339_p4 = scmp.ne.s32.totalorder %s1861_s17, %s1338_s8  ;;  %p1343_p10 = scmp.lt.u32.totalorder %s1861_s17, %s1938_s5 }
 0x1c6   : > { %p1344_p13 = scmp.lt.u32.totalorder %s1342_s26, %s1338_s8  ;;  %p1346_p7 = scmp.lt.u32.totalorder %s1338_s8, %s1861_s17 }
 0x1c7   : > { %p1340_p6 = pnand %p1339_p4, %p1535_p12 }
 0x1c8   : > { %p1345_p3 = por %p1344_p13, %p1343_p10 }
 0x1c9   : > { %p1341_p8 = pneg %p1340_p6 }
 0x1ca   : > { %p1347_p9 = por %p1346_p7, %p1345_p3 }
 0x1cc   : > { %p1348_p1 = pnand %p1347_p9, %p1341_p8 }
 0x1ce   : > { %1351 = shalt.err (!%p1348_p1)
}
 0x1cf   : > { %1147 = dma.vmem_to_hbm [thread:$0]  (%p1535_p12), %s1863_s28, 16, %s1861_s17, %s1865_s6  }
 0x1d0 PF: > { %s821_s22 = sand.u32 1, %s1386_s18   ;;  %p1953_p0 = scmp.ne.s32.totalorder %s1943_s25, 0 }
 0x1d1   : > { %p1954_p5 = scmp.ge.s32.totalorder %s1398_s21, 2  ;;  %s822_s16 = scalar_lea.sflag [#allocation4], %s821_s22 }
 0x1d3   : > { %p1160_p11 = pnand %p1954_p5, %p1953_p0 }
 0x1d5   : > { %1377 = dma.done.wait (!%p1160_p11), %s822_s16, 4096  }
 0x1d6   : > { %1379 = vsyncadd (!%p1160_p11), %s822_s16, 4294963200  ;;  %s830_s12 = sand.u32 1, %s942_s23  }
 0x1d7   : > { %s831_s27 = scalar_lea.sflag [#allocation9], %s830_s12 }
 0x1d8   : > { %1381 = dma.done.wait (!%p1160_p11), %s831_s27, 32  }
 0x1d9   : > { %1383 = vsyncadd (!%p1160_p11), %s831_s27, 4294967264  ;;  %p23_p12 = scmp.ge.s32.totalorder %s1497_s30, 4   ;;  %s1955_s18 = smov %s1390_s19 }
 0x1da   : > { %s1956_s19 = smov %s1394_s20  ;;  %s1957_s20 = smov %s1531_s9 }
 0x1db   : > { %s1958_s21 = smov %s1497_s30  ;;  %25 = sbr.rel (!%p23_p12) target bundleno = 8 (0x8), region = 113 }
 0x1e2   :  { %843 = vsyncpa [#allocation3], 1 }
 0x1e3   :  { %845 = vsyncpa [#allocation3 + $0x1], 1 }
 0x1e4   :  { %846 = vsyncpa [#allocation6], 1 }
 0x1e5   :  { %847 = vsyncpa [#allocation4], 1 }
 0x1e6   :  { %849 = vsyncpa [#allocation4 + $0x1], 1 }
 0x1e7   :  { %850 = vsyncpa [#allocation9], 1 }
 0x1e8   :  { %852 = vsyncpa [#allocation9 + $0x1], 1 }

</bundles_post_ra>
